<compile_context>
chip_gen: v7x
topology: tpu7x:2x2x1
jax: 0.10.0
libtpu: 0.0.40
codegen_flags: <defaults>
</compile_context>

<pallas_src>
import functools

import jax
import jax.numpy as jnp
from jax import lax
from jax.experimental import pallas as pl
from jax.experimental.pallas import tpu as pltpu


def _round_up(x, m):
    return (x + m - 1) // m * m


def _convlstm_kernel(x_ref, w_ref, b_ref, c_ref, h_out_ref, c_out_ref, *,
                     hid_p, K, W, nt, n_strips):
    """One (batch element, spatial strip) per grid step.

    x_ref     : (cin_p, lp)            bf16  vertically zero-padded, flattened
                                             combined frame (+lane guards)
    w_ref     : (K*K, 4*hid_p, cin_p)  bf16  per-tap conv weights, gate-major
    b_ref     : (4*hid_p, 1)           f32   conv bias
    c_ref     : (hid_p, nt)            f32   previous cell state strip
    h_out_ref : (hid_p, nt)            f32
    c_out_ref : (hid_p, nt)            f32
    """
    pad = K // 2

    if n_strips == 1:
        base = 0                                   # static offsets in the common case
    else:
        base = pl.multiple_of(pl.program_id(1) * nt, 128)

    # Column index of every lane in this strip (row-major flattening of HxW).
    col = (base + lax.broadcasted_iota(jnp.int32, (1, nt), 1)) % W

    # In-kernel tap expansion: K*K shifted lane-slices of the resident frame,
    # masked at the left/right image borders, accumulated as partial matmuls.
    acc = jnp.zeros((4 * hid_p, nt), jnp.float32)
    for dy in range(K):
        for dx in range(K):
            tap = x_ref[:, pl.ds(base + dy * W + dx, nt)]      # (cin_p, nt) bf16
            ox = dx - pad
            if ox != 0:
                valid = jnp.logical_and(col + ox >= 0, col + ox < W)
                tap = tap * valid.astype(tap.dtype)            # zero-pad columns
            acc = acc + jnp.dot(w_ref[dy * K + dx], tap,
                                preferred_element_type=jnp.float32)
    acc = acc + b_ref[...]                                     # (4*hid_p, nt)

    def _sigmoid(v):
        # 0.5*tanh(0.5*v)+0.5 == sigmoid(v); one EUP op instead of exp+divide.
        return 0.5 * jnp.tanh(0.5 * v) + 0.5

    # Gate order matches torch.chunk(conv_out, 4, dim=1): [i, f, o, g].
    # hid_p is a multiple of 8, so every slice is a free sublane-aligned view.
    i = _sigmoid(acc[0 * hid_p:1 * hid_p])
    f = _sigmoid(acc[1 * hid_p:2 * hid_p])
    o = _sigmoid(acc[2 * hid_p:3 * hid_p])
    g = jnp.tanh(acc[3 * hid_p:4 * hid_p])

    c_prev = c_ref[...]
    c_new = f * c_prev + i * g
    h_new = o * jnp.tanh(c_new)

    c_out_ref[...] = c_new                                     # lane-dense stores
    h_out_ref[...] = h_new


def _vmem_limit_bytes():
    """Generation-aware scoped-VMEM limit (half of physical capacity)."""
    try:
        cap = pltpu.get_tpu_info().vmem_capacity_bytes         # 64 MiB v7x, 128 MiB v5e/v6e
    except Exception:
        cap = 64 << 20                                         # conservative default
    return int(min(cap // 2, 96 << 20))


def _pick_strip(hw_pad, hid_p, cin_p, lp, kk, vmem_limit):
    """Largest multiple-of-128 strip that divides hw_pad and keeps the real
    VMEM consumers under ~70% of the scoped limit.  Never returns < 128."""
    budget = int(0.70 * vmem_limit)
    fixed = (2 * cin_p * lp * 2                 # double-buffered bf16 frame block
             + 2 * kk * 4 * hid_p * cin_p * 2   # weight block (constant index; 2 allocs)
             + 2 * 4 * hid_p * 4)               # bias block
    per_lane = (3 * 2 * hid_p * 4               # c_in / h_out / c_out, double-buffered f32
                + 4 * (4 * hid_p) * 4)          # acc + gate temporaries headroom (f32)
    avail = max(budget - fixed, 0)
    nt_cap = min(hw_pad, 2048, max(128, (avail // per_lane) // 128 * 128))
    for nt in range(nt_cap, 127, -128):
        if hw_pad % nt == 0:
            return nt
    return 128
    # TODO(synk): for frames whose full (cin_p, lp) slab exceeds the VMEM budget,
    # switch to a row-band halo DMA (manual double-buffer, memory_space=pl.ANY)
    # instead of keeping the whole padded frame resident per batch element.


def prepare_conv_lstm_params(weight_oihw, bias):
    """One-time (per sequence) weight prep: OIHW -> (K*K, 4*hid_p, cin_p) bf16
    with gate-major row blocks padded to hid_p (mult of 8) and the input-channel
    axis padded to cin_p (mult of 16, bf16 sublane tile)."""
    O, Cin, K, _ = weight_oihw.shape
    hid = O // 4
    hid_p = _round_up(hid, 8)
    cin_p = _round_up(Cin, 16)
    w = weight_oihw.reshape(4, hid, Cin, K, K)
    w = jnp.pad(w, ((0, 0), (0, hid_p - hid), (0, cin_p - Cin), (0, 0), (0, 0)))
    # (4, hid_p, cin_p, Kh, Kw) -> (Kh, Kw, 4, hid_p, cin_p) -> (K*K, 4*hid_p, cin_p)
    w_taps = jnp.transpose(w, (3, 4, 0, 1, 2)).reshape(K * K, 4 * hid_p, cin_p)
    w_taps = w_taps.astype(jnp.bfloat16)
    b = jnp.pad(bias.reshape(4, hid), ((0, 0), (0, hid_p - hid)))
    b_col = b.reshape(4 * hid_p, 1).astype(jnp.float32)
    return w_taps, b_col


def conv_lstm_cell_prepared(x_nchw, h_prev_nchw, c_prev_nchw, w_taps, b_col):
    """Forward pass with pre-prepared weights (PyTorch NCHW convention)."""
    B, Cx, H, W = x_nchw.shape
    hid = h_prev_nchw.shape[1]
    Cin = Cx + hid
    KK, four_hid_p, cin_p = w_taps.shape
    K = int(round(KK ** 0.5))
    assert K * K == KK and K % 2 == 1, "ConvLSTMCell assumes an odd kernel size"
    pad = K // 2
    hid_p = four_hid_p // 4
    assert cin_p >= Cin and hid_p >= hid

    HW = H * W
    hw_pad = _round_up(HW, 128)                         # lane-dense output stores
    # Flattened padded length: left guard `pad` (horizontal taps of column 0),
    # vertically padded frame, right guard covering the last tap window.
    lp = _round_up(max(pad + (H + 2 * pad) * W,
                       hw_pad + (K - 1) * (W + 1)), 128)

    # --- wrapper glue: one fused pad/cast pass over the activations ---------
    combined = jnp.concatenate([x_nchw, h_prev_nchw], axis=1).astype(jnp.bfloat16)
    combined = jnp.pad(combined,
                       ((0, 0), (0, cin_p - Cin), (pad, pad), (0, 0)))  # chan + vert pad
    flat = combined.reshape(B, cin_p, (H + 2 * pad) * W)
    flat = jnp.pad(flat, ((0, 0), (0, 0),
                          (pad, lp - pad - (H + 2 * pad) * W)))         # lane guards

    c_in = c_prev_nchw.reshape(B, hid, HW).astype(jnp.float32)
    if hid_p != hid or hw_pad != HW:
        c_in = jnp.pad(c_in, ((0, 0), (0, hid_p - hid), (0, hw_pad - HW)))

    vmem_limit = _vmem_limit_bytes()
    nt = _pick_strip(hw_pad, hid_p, cin_p, lp, KK, vmem_limit)
    n_strips = hw_pad // nt

    kernel = functools.partial(_convlstm_kernel, hid_p=hid_p, K=K, W=W,
                               nt=nt, n_strips=n_strips)

    h_out, c_out = pl.pallas_call(
        kernel,
        out_shape=(
            jax.ShapeDtypeStruct((B, hid_p, hw_pad), jnp.float32),
            jax.ShapeDtypeStruct((B, hid_p, hw_pad), jnp.float32),
        ),
        grid_spec=pltpu.PrefetchScalarGridSpec(
            num_scalar_prefetch=0,
            grid=(B, n_strips),
            in_specs=[
                # Whole padded frame of batch b stays resident across its strips
                # (constant block index along s => DMA'd once per batch element).
                pl.BlockSpec((None, cin_p, lp), lambda b, s: (b, 0, 0)),
                pl.BlockSpec((KK, four_hid_p, cin_p), lambda b, s: (0, 0, 0)),
                pl.BlockSpec((four_hid_p, 1), lambda b, s: (0, 0)),
                pl.BlockSpec((None, hid_p, nt), lambda b, s: (b, 0, s)),
            ],
            out_specs=[
                pl.BlockSpec((None, hid_p, nt), lambda b, s: (b, 0, s)),
                pl.BlockSpec((None, hid_p, nt), lambda b, s: (b, 0, s)),
            ],
        ),
        compiler_params=pltpu.CompilerParams(
            dimension_semantics=("parallel", "parallel"),
            vmem_limit_bytes=vmem_limit),
    )(flat, w_taps, b_col, c_in)

    # Free reshapes back to NCHW (kernel layout is already channel-major);
    # padded channels / spatial tail (if any) are sliced away.
    h_out = h_out[:, :hid, :HW].reshape(B, hid, H, W)
    c_out = c_out[:, :hid, :HW].reshape(B, hid, H, W)
    return h_out, c_out


def conv_lstm_cell(x_nchw, h_prev_nchw, c_prev_nchw, weight_oihw, bias):
    """Drop-in forward pass (prepares the weights per call — prefer the
    prepare_conv_lstm_params + conv_lstm_cell_prepared pair in a rollout)."""
    w_taps, b_col = prepare_conv_lstm_params(weight_oihw, bias)
    return conv_lstm_cell_prepared(x_nchw, h_prev_nchw, c_prev_nchw, w_taps, b_col)


def _reference(x, h_prev, c_prev, w, b):
    """Pure-JAX f32 reference mirroring the PyTorch forward (NCHW conv)."""
    combined = jnp.concatenate([x, h_prev], axis=1)
    pad = w.shape[-1] // 2
    conv = lax.conv_general_dilated(
        combined, w, window_strides=(1, 1),
        padding=((pad, pad), (pad, pad)),
        dimension_numbers=("NCHW", "OIHW", "NCHW"))
    conv = conv + b.reshape(1, -1, 1, 1)
    cc_i, cc_f, cc_o, cc_g = jnp.split(conv, 4, axis=1)
    i = jax.nn.sigmoid(cc_i)
    f = jax.nn.sigmoid(cc_f)
    o = jax.nn.sigmoid(cc_o)
    g = jnp.tanh(cc_g)
    c = f * c_prev + i * g
    h = o * jnp.tanh(c)
    return h, c


if __name__ == "__main__":
    # ConvLSTMCell(input_dim=4, hidden_dim=8, kernel_size=3) on 16x16 frames.
    B, input_dim, hidden_dim, K = 2, 4, 8, 3
    H = W = 16

    key = jax.random.PRNGKey(0)
    kx, kh, kc, kw, kb = jax.random.split(key, 5)
    x = jax.random.normal(kx, (B, input_dim, H, W), dtype=jnp.float32)
    h_prev = jax.random.normal(kh, (B, hidden_dim, H, W), dtype=jnp.float32)
    c_prev = jax.random.normal(kc, (B, hidden_dim, H, W), dtype=jnp.float32)

    weight = 0.1 * jax.random.normal(
        kw, (4 * hidden_dim, input_dim + hidden_dim, K, K), dtype=jnp.float32)
    bias = 0.1 * jax.random.normal(kb, (4 * hidden_dim,), dtype=jnp.float32)

    # Weight prep hoisted: in a recurrent rollout this runs once per sequence.
    w_taps, b_col = prepare_conv_lstm_params(weight, bias)

    fwd = jax.jit(conv_lstm_cell_prepared)
    h_out, c_out = fwd(x, h_prev, c_prev, w_taps, b_col)
    jax.block_until_ready((h_out, c_out))

    h_ref, c_ref = _reference(x, h_prev, c_prev, weight, bias)
    assert h_out.shape == (B, hidden_dim, H, W)
    assert c_out.shape == (B, hidden_dim, H, W)
    # bf16 matmul inputs (f32 accumulate + f32 gate math) -> relaxed tolerance.
    assert jnp.allclose(h_out, h_ref, atol=5e-2, rtol=5e-2)
    assert jnp.allclose(c_out, c_ref, atol=5e-2, rtol=5e-2)

    print("KERNEL_OK")
</pallas_src>

<mosaic_0001>
module attributes {stable_mosaic.version = 11 : i64} {
  func.func @_convlstm_kernel(%arg0: i32, %arg1: i32, %arg2: memref<1x16x384xbf16, #tpu.memory_space<vmem>>, %arg3: memref<9x32x16xbf16, #tpu.memory_space<vmem>>, %arg4: memref<32x1xf32, #tpu.memory_space<vmem>>, %arg5: memref<1x8x256xf32, #tpu.memory_space<vmem>>, %arg6: memref<1x8x256xf32, #tpu.memory_space<vmem>>, %arg7: memref<1x8x256xf32, #tpu.memory_space<vmem>>) attributes {dimension_semantics = [#tpu.dimension_semantics<parallel>, #tpu.dimension_semantics<parallel>], iteration_bounds = array<i64: 2, 1>, scalar_prefetch = 0 : i64, scratch_operands = 0 : i64, tpu.core_type = #tpu.core_type<tc>, window_params = [{transform_indices = @transform_0, window_bounds = array<i64: 1, 16, 384>}, {pipeline_mode = #tpu.pipeline_mode<synchronous>, transform_indices = @transform_1, window_bounds = array<i64: 9, 32, 16>}, {pipeline_mode = #tpu.pipeline_mode<synchronous>, transform_indices = @transform_2, window_bounds = array<i64: 32, 1>}, {transform_indices = @transform_3, window_bounds = array<i64: 1, 8, 256>}, {transform_indices = @transform_4, window_bounds = array<i64: 1, 8, 256>}, {transform_indices = @transform_5, window_bounds = array<i64: 1, 8, 256>}]} {
    %0 = tpu.iota {dimensions = array<i32: 1>} : vector<1x256xi32>
    %c0_i32 = arith.constant 0 : i32
    %1 = vector.broadcast %c0_i32 : i32 to vector<1x256xi32>
    %2 = arith.addi %1, %0 : vector<1x256xi32>
    %c16_i32 = arith.constant 16 : i32
    %c0_i32_0 = arith.constant 0 : i32
    %3 = arith.cmpi eq, %c16_i32, %c0_i32_0 : i32
    %c1_i32 = arith.constant 1 : i32
    %4 = arith.select %3, %c1_i32, %c16_i32 : i32
    %5 = vector.broadcast %4 : i32 to vector<1x256xi32>
    %6 = arith.remsi %2, %5 : vector<1x256xi32>
    %c0_i32_1 = arith.constant 0 : i32
    %7 = vector.broadcast %c0_i32_1 : i32 to vector<1x256xi32>
    %8 = arith.cmpi ne, %6, %7 : vector<1x256xi32>
    %c0_i32_2 = arith.constant 0 : i32
    %9 = vector.broadcast %c0_i32_2 : i32 to vector<1x256xi32>
    %10 = arith.cmpi slt, %6, %9 : vector<1x256xi32>
    %c0_i32_3 = arith.constant 0 : i32
    %11 = arith.cmpi slt, %4, %c0_i32_3 : i32
    %12 = vector.broadcast %11 : i1 to vector<1x256xi1>
    %13 = vector.broadcast %12 : vector<1x256xi1> to vector<1x256xi1>
    %14 = arith.xori %10, %13 : vector<1x256xi1>
    %15 = arith.andi %14, %8 : vector<1x256xi1>
    %16 = vector.broadcast %4 : i32 to vector<1x256xi32>
    %17 = arith.addi %6, %16 : vector<1x256xi32>
    %18 = arith.select %15, %17, %6 : vector<1x256xi1>, vector<1x256xi32>
    %cst = arith.constant 0.000000e+00 : f32
    %19 = vector.broadcast %cst : f32 to vector<32x256xf32>
    %c0 = arith.constant 0 : index
    %c0_4 = arith.constant 0 : index
    %c0_5 = arith.constant 0 : index
    %20 = vector.load %arg2[%c0, %c0_4, %c0_5] : memref<1x16x384xbf16, #tpu.memory_space<vmem>>, vector<1x16x256xbf16>
    %21 = vector.shape_cast %20 : vector<1x16x256xbf16> to vector<16x256xbf16>
    %c-1_i32 = arith.constant -1 : i32
    %22 = vector.broadcast %c-1_i32 : i32 to vector<1x256xi32>
    %23 = arith.addi %18, %22 : vector<1x256xi32>
    %c0_i32_6 = arith.constant 0 : i32
    %24 = vector.broadcast %c0_i32_6 : i32 to vector<1x256xi32>
    %25 = arith.cmpi sge, %23, %24 : vector<1x256xi32>
    %c-1_i32_7 = arith.constant -1 : i32
    %26 = vector.broadcast %c-1_i32_7 : i32 to vector<1x256xi32>
    %27 = arith.addi %18, %26 : vector<1x256xi32>
    %c16_i32_8 = arith.constant 16 : i32
    %28 = vector.broadcast %c16_i32_8 : i32 to vector<1x256xi32>
    %29 = arith.cmpi slt, %27, %28 : vector<1x256xi32>
    %30 = arith.andi %25, %29 : vector<1x256xi1>
    %31 = arith.extui %30 : vector<1x256xi1> to vector<1x256xi32>
    %32 = arith.sitofp %31 : vector<1x256xi32> to vector<1x256xf32>
    %33 = arith.truncf %32 : vector<1x256xf32> to vector<1x256xbf16>
    %34 = vector.broadcast %33 : vector<1x256xbf16> to vector<16x256xbf16>
    %35 = arith.mulf %21, %34 : vector<16x256xbf16>
    %c0_9 = arith.constant 0 : index
    %c0_10 = arith.constant 0 : index
    %c0_11 = arith.constant 0 : index
    %36 = vector.load %arg3[%c0_9, %c0_10, %c0_11] : memref<9x32x16xbf16, #tpu.memory_space<vmem>>, vector<1x32x16xbf16>
    %37 = vector.shape_cast %36 : vector<1x32x16xbf16> to vector<32x16xbf16>
    %cst_12 = arith.constant dense<0.000000e+00> : vector<32x256xf32>
    %38 = tpu.matmul %37, %35, %cst_12 {dimension_numbers = #tpu.dot_dimension_numbers<[1], [0], [0], [1], [0, 0, 1, 1], [], []>} : vector<32x16xbf16>, vector<16x256xbf16>, vector<32x256xf32> -> vector<32x256xf32>
    %39 = arith.addf %19, %38 : vector<32x256xf32>
    %c0_13 = arith.constant 0 : index
    %c0_14 = arith.constant 0 : index
    %c1 = arith.constant 1 : index
    %40 = vector.load %arg2[%c0_13, %c0_14, %c1] : memref<1x16x384xbf16, #tpu.memory_space<vmem>>, vector<1x16x256xbf16>
    %41 = vector.shape_cast %40 : vector<1x16x256xbf16> to vector<16x256xbf16>
    %c1_15 = arith.constant 1 : index
    %c0_16 = arith.constant 0 : index
    %c0_17 = arith.constant 0 : index
    %42 = vector.load %arg3[%c1_15, %c0_16, %c0_17] : memref<9x32x16xbf16, #tpu.memory_space<vmem>>, vector<1x32x16xbf16>
    %43 = vector.shape_cast %42 : vector<1x32x16xbf16> to vector<32x16xbf16>
    %cst_18 = arith.constant dense<0.000000e+00> : vector<32x256xf32>
    %44 = tpu.matmul %43, %41, %cst_18 {dimension_numbers = #tpu.dot_dimension_numbers<[1], [0], [0], [1], [0, 0, 1, 1], [], []>} : vector<32x16xbf16>, vector<16x256xbf16>, vector<32x256xf32> -> vector<32x256xf32>
    %45 = arith.addf %39, %44 : vector<32x256xf32>
    %c0_19 = arith.constant 0 : index
    %c0_20 = arith.constant 0 : index
    %c2 = arith.constant 2 : index
    %46 = vector.load %arg2[%c0_19, %c0_20, %c2] : memref<1x16x384xbf16, #tpu.memory_space<vmem>>, vector<1x16x256xbf16>
    %47 = vector.shape_cast %46 : vector<1x16x256xbf16> to vector<16x256xbf16>
    %c1_i32_21 = arith.constant 1 : i32
    %48 = vector.broadcast %c1_i32_21 : i32 to vector<1x256xi32>
    %49 = arith.addi %18, %48 : vector<1x256xi32>
    %c0_i32_22 = arith.constant 0 : i32
    %50 = vector.broadcast %c0_i32_22 : i32 to vector<1x256xi32>
    %51 = arith.cmpi sge, %49, %50 : vector<1x256xi32>
    %c1_i32_23 = arith.constant 1 : i32
    %52 = vector.broadcast %c1_i32_23 : i32 to vector<1x256xi32>
    %53 = arith.addi %18, %52 : vector<1x256xi32>
    %c16_i32_24 = arith.constant 16 : i32
    %54 = vector.broadcast %c16_i32_24 : i32 to vector<1x256xi32>
    %55 = arith.cmpi slt, %53, %54 : vector<1x256xi32>
    %56 = arith.andi %51, %55 : vector<1x256xi1>
    %57 = arith.extui %56 : vector<1x256xi1> to vector<1x256xi32>
    %58 = arith.sitofp %57 : vector<1x256xi32> to vector<1x256xf32>
    %59 = arith.truncf %58 : vector<1x256xf32> to vector<1x256xbf16>
    %60 = vector.broadcast %59 : vector<1x256xbf16> to vector<16x256xbf16>
    %61 = arith.mulf %47, %60 : vector<16x256xbf16>
    %c2_25 = arith.constant 2 : index
    %c0_26 = arith.constant 0 : index
    %c0_27 = arith.constant 0 : index
    %62 = vector.load %arg3[%c2_25, %c0_26, %c0_27] : memref<9x32x16xbf16, #tpu.memory_space<vmem>>, vector<1x32x16xbf16>
    %63 = vector.shape_cast %62 : vector<1x32x16xbf16> to vector<32x16xbf16>
    %cst_28 = arith.constant dense<0.000000e+00> : vector<32x256xf32>
    %64 = tpu.matmul %63, %61, %cst_28 {dimension_numbers = #tpu.dot_dimension_numbers<[1], [0], [0], [1], [0, 0, 1, 1], [], []>} : vector<32x16xbf16>, vector<16x256xbf16>, vector<32x256xf32> -> vector<32x256xf32>
    %65 = arith.addf %45, %64 : vector<32x256xf32>
    %c0_29 = arith.constant 0 : index
    %c0_30 = arith.constant 0 : index
    %c16 = arith.constant 16 : index
    %66 = vector.load %arg2[%c0_29, %c0_30, %c16] : memref<1x16x384xbf16, #tpu.memory_space<vmem>>, vector<1x16x256xbf16>
    %67 = vector.shape_cast %66 : vector<1x16x256xbf16> to vector<16x256xbf16>
    %c-1_i32_31 = arith.constant -1 : i32
    %68 = vector.broadcast %c-1_i32_31 : i32 to vector<1x256xi32>
    %69 = arith.addi %18, %68 : vector<1x256xi32>
    %c0_i32_32 = arith.constant 0 : i32
    %70 = vector.broadcast %c0_i32_32 : i32 to vector<1x256xi32>
    %71 = arith.cmpi sge, %69, %70 : vector<1x256xi32>
    %c-1_i32_33 = arith.constant -1 : i32
    %72 = vector.broadcast %c-1_i32_33 : i32 to vector<1x256xi32>
    %73 = arith.addi %18, %72 : vector<1x256xi32>
    %c16_i32_34 = arith.constant 16 : i32
    %74 = vector.broadcast %c16_i32_34 : i32 to vector<1x256xi32>
    %75 = arith.cmpi slt, %73, %74 : vector<1x256xi32>
    %76 = arith.andi %71, %75 : vector<1x256xi1>
    %77 = arith.extui %76 : vector<1x256xi1> to vector<1x256xi32>
    %78 = arith.sitofp %77 : vector<1x256xi32> to vector<1x256xf32>
    %79 = arith.truncf %78 : vector<1x256xf32> to vector<1x256xbf16>
    %80 = vector.broadcast %79 : vector<1x256xbf16> to vector<16x256xbf16>
    %81 = arith.mulf %67, %80 : vector<16x256xbf16>
    %c3 = arith.constant 3 : index
    %c0_35 = arith.constant 0 : index
    %c0_36 = arith.constant 0 : index
    %82 = vector.load %arg3[%c3, %c0_35, %c0_36] : memref<9x32x16xbf16, #tpu.memory_space<vmem>>, vector<1x32x16xbf16>
    %83 = vector.shape_cast %82 : vector<1x32x16xbf16> to vector<32x16xbf16>
    %cst_37 = arith.constant dense<0.000000e+00> : vector<32x256xf32>
    %84 = tpu.matmul %83, %81, %cst_37 {dimension_numbers = #tpu.dot_dimension_numbers<[1], [0], [0], [1], [0, 0, 1, 1], [], []>} : vector<32x16xbf16>, vector<16x256xbf16>, vector<32x256xf32> -> vector<32x256xf32>
    %85 = arith.addf %65, %84 : vector<32x256xf32>
    %c0_38 = arith.constant 0 : index
    %c0_39 = arith.constant 0 : index
    %c17 = arith.constant 17 : index
    %86 = vector.load %arg2[%c0_38, %c0_39, %c17] : memref<1x16x384xbf16, #tpu.memory_space<vmem>>, vector<1x16x256xbf16>
    %87 = vector.shape_cast %86 : vector<1x16x256xbf16> to vector<16x256xbf16>
    %c4 = arith.constant 4 : index
    %c0_40 = arith.constant 0 : index
    %c0_41 = arith.constant 0 : index
    %88 = vector.load %arg3[%c4, %c0_40, %c0_41] : memref<9x32x16xbf16, #tpu.memory_space<vmem>>, vector<1x32x16xbf16>
    %89 = vector.shape_cast %88 : vector<1x32x16xbf16> to vector<32x16xbf16>
    %cst_42 = arith.constant dense<0.000000e+00> : vector<32x256xf32>
    %90 = tpu.matmul %89, %87, %cst_42 {dimension_numbers = #tpu.dot_dimension_numbers<[1], [0], [0], [1], [0, 0, 1, 1], [], []>} : vector<32x16xbf16>, vector<16x256xbf16>, vector<32x256xf32> -> vector<32x256xf32>
    %91 = arith.addf %85, %90 : vector<32x256xf32>
    %c0_43 = arith.constant 0 : index
    %c0_44 = arith.constant 0 : index
    %c18 = arith.constant 18 : index
    %92 = vector.load %arg2[%c0_43, %c0_44, %c18] : memref<1x16x384xbf16, #tpu.memory_space<vmem>>, vector<1x16x256xbf16>
    %93 = vector.shape_cast %92 : vector<1x16x256xbf16> to vector<16x256xbf16>
    %c1_i32_45 = arith.constant 1 : i32
    %94 = vector.broadcast %c1_i32_45 : i32 to vector<1x256xi32>
    %95 = arith.addi %18, %94 : vector<1x256xi32>
    %c0_i32_46 = arith.constant 0 : i32
    %96 = vector.broadcast %c0_i32_46 : i32 to vector<1x256xi32>
    %97 = arith.cmpi sge, %95, %96 : vector<1x256xi32>
    %c1_i32_47 = arith.constant 1 : i32
    %98 = vector.broadcast %c1_i32_47 : i32 to vector<1x256xi32>
    %99 = arith.addi %18, %98 : vector<1x256xi32>
    %c16_i32_48 = arith.constant 16 : i32
    %100 = vector.broadcast %c16_i32_48 : i32 to vector<1x256xi32>
    %101 = arith.cmpi slt, %99, %100 : vector<1x256xi32>
    %102 = arith.andi %97, %101 : vector<1x256xi1>
    %103 = arith.extui %102 : vector<1x256xi1> to vector<1x256xi32>
    %104 = arith.sitofp %103 : vector<1x256xi32> to vector<1x256xf32>
    %105 = arith.truncf %104 : vector<1x256xf32> to vector<1x256xbf16>
    %106 = vector.broadcast %105 : vector<1x256xbf16> to vector<16x256xbf16>
    %107 = arith.mulf %93, %106 : vector<16x256xbf16>
    %c5 = arith.constant 5 : index
    %c0_49 = arith.constant 0 : index
    %c0_50 = arith.constant 0 : index
    %108 = vector.load %arg3[%c5, %c0_49, %c0_50] : memref<9x32x16xbf16, #tpu.memory_space<vmem>>, vector<1x32x16xbf16>
    %109 = vector.shape_cast %108 : vector<1x32x16xbf16> to vector<32x16xbf16>
    %cst_51 = arith.constant dense<0.000000e+00> : vector<32x256xf32>
    %110 = tpu.matmul %109, %107, %cst_51 {dimension_numbers = #tpu.dot_dimension_numbers<[1], [0], [0], [1], [0, 0, 1, 1], [], []>} : vector<32x16xbf16>, vector<16x256xbf16>, vector<32x256xf32> -> vector<32x256xf32>
    %111 = arith.addf %91, %110 : vector<32x256xf32>
    %c0_52 = arith.constant 0 : index
    %c0_53 = arith.constant 0 : index
    %c32 = arith.constant 32 : index
    %112 = vector.load %arg2[%c0_52, %c0_53, %c32] : memref<1x16x384xbf16, #tpu.memory_space<vmem>>, vector<1x16x256xbf16>
    %113 = vector.shape_cast %112 : vector<1x16x256xbf16> to vector<16x256xbf16>
    %c-1_i32_54 = arith.constant -1 : i32
    %114 = vector.broadcast %c-1_i32_54 : i32 to vector<1x256xi32>
    %115 = arith.addi %18, %114 : vector<1x256xi32>
    %c0_i32_55 = arith.constant 0 : i32
    %116 = vector.broadcast %c0_i32_55 : i32 to vector<1x256xi32>
    %117 = arith.cmpi sge, %115, %116 : vector<1x256xi32>
    %c-1_i32_56 = arith.constant -1 : i32
    %118 = vector.broadcast %c-1_i32_56 : i32 to vector<1x256xi32>
    %119 = arith.addi %18, %118 : vector<1x256xi32>
    %c16_i32_57 = arith.constant 16 : i32
    %120 = vector.broadcast %c16_i32_57 : i32 to vector<1x256xi32>
    %121 = arith.cmpi slt, %119, %120 : vector<1x256xi32>
    %122 = arith.andi %117, %121 : vector<1x256xi1>
    %123 = arith.extui %122 : vector<1x256xi1> to vector<1x256xi32>
    %124 = arith.sitofp %123 : vector<1x256xi32> to vector<1x256xf32>
    %125 = arith.truncf %124 : vector<1x256xf32> to vector<1x256xbf16>
    %126 = vector.broadcast %125 : vector<1x256xbf16> to vector<16x256xbf16>
    %127 = arith.mulf %113, %126 : vector<16x256xbf16>
    %c6 = arith.constant 6 : index
    %c0_58 = arith.constant 0 : index
    %c0_59 = arith.constant 0 : index
    %128 = vector.load %arg3[%c6, %c0_58, %c0_59] : memref<9x32x16xbf16, #tpu.memory_space<vmem>>, vector<1x32x16xbf16>
    %129 = vector.shape_cast %128 : vector<1x32x16xbf16> to vector<32x16xbf16>
    %cst_60 = arith.constant dense<0.000000e+00> : vector<32x256xf32>
    %130 = tpu.matmul %129, %127, %cst_60 {dimension_numbers = #tpu.dot_dimension_numbers<[1], [0], [0], [1], [0, 0, 1, 1], [], []>} : vector<32x16xbf16>, vector<16x256xbf16>, vector<32x256xf32> -> vector<32x256xf32>
    %131 = arith.addf %111, %130 : vector<32x256xf32>
    %c0_61 = arith.constant 0 : index
    %c0_62 = arith.constant 0 : index
    %c33 = arith.constant 33 : index
    %132 = vector.load %arg2[%c0_61, %c0_62, %c33] : memref<1x16x384xbf16, #tpu.memory_space<vmem>>, vector<1x16x256xbf16>
    %133 = vector.shape_cast %132 : vector<1x16x256xbf16> to vector<16x256xbf16>
    %c7 = arith.constant 7 : index
    %c0_63 = arith.constant 0 : index
    %c0_64 = arith.constant 0 : index
    %134 = vector.load %arg3[%c7, %c0_63, %c0_64] : memref<9x32x16xbf16, #tpu.memory_space<vmem>>, vector<1x32x16xbf16>
    %135 = vector.shape_cast %134 : vector<1x32x16xbf16> to vector<32x16xbf16>
    %cst_65 = arith.constant dense<0.000000e+00> : vector<32x256xf32>
    %136 = tpu.matmul %135, %133, %cst_65 {dimension_numbers = #tpu.dot_dimension_numbers<[1], [0], [0], [1], [0, 0, 1, 1], [], []>} : vector<32x16xbf16>, vector<16x256xbf16>, vector<32x256xf32> -> vector<32x256xf32>
    %137 = arith.addf %131, %136 : vector<32x256xf32>
    %c0_66 = arith.constant 0 : index
    %c0_67 = arith.constant 0 : index
    %c34 = arith.constant 34 : index
    %138 = vector.load %arg2[%c0_66, %c0_67, %c34] : memref<1x16x384xbf16, #tpu.memory_space<vmem>>, vector<1x16x256xbf16>
    %139 = vector.shape_cast %138 : vector<1x16x256xbf16> to vector<16x256xbf16>
    %c1_i32_68 = arith.constant 1 : i32
    %140 = vector.broadcast %c1_i32_68 : i32 to vector<1x256xi32>
    %141 = arith.addi %18, %140 : vector<1x256xi32>
    %c0_i32_69 = arith.constant 0 : i32
    %142 = vector.broadcast %c0_i32_69 : i32 to vector<1x256xi32>
    %143 = arith.cmpi sge, %141, %142 : vector<1x256xi32>
    %c1_i32_70 = arith.constant 1 : i32
    %144 = vector.broadcast %c1_i32_70 : i32 to vector<1x256xi32>
    %145 = arith.addi %18, %144 : vector<1x256xi32>
    %c16_i32_71 = arith.constant 16 : i32
    %146 = vector.broadcast %c16_i32_71 : i32 to vector<1x256xi32>
    %147 = arith.cmpi slt, %145, %146 : vector<1x256xi32>
    %148 = arith.andi %143, %147 : vector<1x256xi1>
    %149 = arith.extui %148 : vector<1x256xi1> to vector<1x256xi32>
    %150 = arith.sitofp %149 : vector<1x256xi32> to vector<1x256xf32>
    %151 = arith.truncf %150 : vector<1x256xf32> to vector<1x256xbf16>
    %152 = vector.broadcast %151 : vector<1x256xbf16> to vector<16x256xbf16>
    %153 = arith.mulf %139, %152 : vector<16x256xbf16>
    %c8 = arith.constant 8 : index
    %c0_72 = arith.constant 0 : index
    %c0_73 = arith.constant 0 : index
    %154 = vector.load %arg3[%c8, %c0_72, %c0_73] : memref<9x32x16xbf16, #tpu.memory_space<vmem>>, vector<1x32x16xbf16>
    %155 = vector.shape_cast %154 : vector<1x32x16xbf16> to vector<32x16xbf16>
    %cst_74 = arith.constant dense<0.000000e+00> : vector<32x256xf32>
    %156 = tpu.matmul %155, %153, %cst_74 {dimension_numbers = #tpu.dot_dimension_numbers<[1], [0], [0], [1], [0, 0, 1, 1], [], []>} : vector<32x16xbf16>, vector<16x256xbf16>, vector<32x256xf32> -> vector<32x256xf32>
    %157 = arith.addf %137, %156 : vector<32x256xf32>
    %c0_75 = arith.constant 0 : index
    %c0_76 = arith.constant 0 : index
    %158 = vector.load %arg4[%c0_75, %c0_76] : memref<32x1xf32, #tpu.memory_space<vmem>>, vector<32x1xf32>
    %159 = vector.broadcast %158 : vector<32x1xf32> to vector<32x256xf32>
    %160 = arith.addf %157, %159 : vector<32x256xf32>
    %161 = vector.extract_strided_slice %160 {offsets = [0, 0], sizes = [8, 256], strides = [1, 1]} : vector<32x256xf32> to vector<8x256xf32>
    %cst_77 = arith.constant 5.000000e-01 : f32
    %162 = vector.broadcast %cst_77 : f32 to vector<8x256xf32>
    %163 = arith.mulf %162, %161 : vector<8x256xf32>
    %164 = math.tanh %163 : vector<8x256xf32>
    %cst_78 = arith.constant 5.000000e-01 : f32
    %165 = vector.broadcast %cst_78 : f32 to vector<8x256xf32>
    %166 = arith.mulf %165, %164 : vector<8x256xf32>
    %cst_79 = arith.constant 5.000000e-01 : f32
    %167 = vector.broadcast %cst_79 : f32 to vector<8x256xf32>
    %168 = arith.addf %166, %167 : vector<8x256xf32>
    %169 = vector.extract_strided_slice %160 {offsets = [8, 0], sizes = [8, 256], strides = [1, 1]} : vector<32x256xf32> to vector<8x256xf32>
    %cst_80 = arith.constant 5.000000e-01 : f32
    %170 = vector.broadcast %cst_80 : f32 to vector<8x256xf32>
    %171 = arith.mulf %170, %169 : vector<8x256xf32>
    %172 = math.tanh %171 : vector<8x256xf32>
    %cst_81 = arith.constant 5.000000e-01 : f32
    %173 = vector.broadcast %cst_81 : f32 to vector<8x256xf32>
    %174 = arith.mulf %173, %172 : vector<8x256xf32>
    %cst_82 = arith.constant 5.000000e-01 : f32
    %175 = vector.broadcast %cst_82 : f32 to vector<8x256xf32>
    %176 = arith.addf %174, %175 : vector<8x256xf32>
    %177 = vector.extract_strided_slice %160 {offsets = [16, 0], sizes = [8, 256], strides = [1, 1]} : vector<32x256xf32> to vector<8x256xf32>
    %cst_83 = arith.constant 5.000000e-01 : f32
    %178 = vector.broadcast %cst_83 : f32 to vector<8x256xf32>
    %179 = arith.mulf %178, %177 : vector<8x256xf32>
    %180 = math.tanh %179 : vector<8x256xf32>
    %cst_84 = arith.constant 5.000000e-01 : f32
    %181 = vector.broadcast %cst_84 : f32 to vector<8x256xf32>
    %182 = arith.mulf %181, %180 : vector<8x256xf32>
    %cst_85 = arith.constant 5.000000e-01 : f32
    %183 = vector.broadcast %cst_85 : f32 to vector<8x256xf32>
    %184 = arith.addf %182, %183 : vector<8x256xf32>
    %185 = vector.extract_strided_slice %160 {offsets = [24, 0], sizes = [8, 256], strides = [1, 1]} : vector<32x256xf32> to vector<8x256xf32>
    %186 = math.tanh %185 : vector<8x256xf32>
    %c0_86 = arith.constant 0 : index
    %c0_87 = arith.constant 0 : index
    %c0_88 = arith.constant 0 : index
    %187 = vector.load %arg5[%c0_86, %c0_87, %c0_88] : memref<1x8x256xf32, #tpu.memory_space<vmem>>, vector<1x8x256xf32>
    %188 = vector.shape_cast %187 : vector<1x8x256xf32> to vector<8x256xf32>
    %189 = arith.mulf %176, %188 : vector<8x256xf32>
    %190 = arith.mulf %168, %186 : vector<8x256xf32>
    %191 = arith.addf %189, %190 : vector<8x256xf32>
    %192 = math.tanh %191 : vector<8x256xf32>
    %193 = arith.mulf %184, %192 : vector<8x256xf32>
    %c0_89 = arith.constant 0 : index
    %c0_90 = arith.constant 0 : index
    %c0_91 = arith.constant 0 : index
    %194 = vector.load %arg7[%c0_89, %c0_90, %c0_91] : memref<1x8x256xf32, #tpu.memory_space<vmem>>, vector<1x8x256xf32>
    %195 = vector.shape_cast %194 : vector<1x8x256xf32> to vector<8x256xf32>
    %196 = vector.shape_cast %191 : vector<8x256xf32> to vector<1x8x256xf32>
    tpu.vector_store %arg7[%c0_89, %c0_90, %c0_91], %196 {strides = array<i32>} : memref<1x8x256xf32, #tpu.memory_space<vmem>>, vector<1x8x256xf32>,
    %c0_92 = arith.constant 0 : index
    %c0_93 = arith.constant 0 : index
    %c0_94 = arith.constant 0 : index
    %197 = vector.load %arg6[%c0_92, %c0_93, %c0_94] : memref<1x8x256xf32, #tpu.memory_space<vmem>>, vector<1x8x256xf32>
    %198 = vector.shape_cast %197 : vector<1x8x256xf32> to vector<8x256xf32>
    %199 = vector.shape_cast %193 : vector<8x256xf32> to vector<1x8x256xf32>
    tpu.vector_store %arg6[%c0_92, %c0_93, %c0_94], %199 {strides = array<i32>} : memref<1x8x256xf32, #tpu.memory_space<vmem>>, vector<1x8x256xf32>,
    return
  }
  func.func @transform_0(%arg0: i32, %arg1: i32) -> (i32, i32, i32) {
    %c0_i32 = arith.constant 0 : i32
    %c0_i32_0 = arith.constant 0 : i32
    %c0_i32_1 = arith.constant 0 : i32
    return %arg0, %c0_i32, %c0_i32_0 : i32, i32, i32
  }
  func.func @transform_1(%arg0: i32, %arg1: i32) -> (i32, i32, i32) {
    %c0_i32 = arith.constant 0 : i32
    %c0_i32_0 = arith.constant 0 : i32
    %c0_i32_1 = arith.constant 0 : i32
    %c0_i32_2 = arith.constant 0 : i32
    return %c0_i32, %c0_i32_0, %c0_i32_1 : i32, i32, i32
  }
  func.func @transform_2(%arg0: i32, %arg1: i32) -> (i32, i32) {
    %c0_i32 = arith.constant 0 : i32
    %c0_i32_0 = arith.constant 0 : i32
    %c0_i32_1 = arith.constant 0 : i32
    return %c0_i32, %c0_i32_0 : i32, i32
  }
  func.func @transform_3(%arg0: i32, %arg1: i32) -> (i32, i32, i32) {
    %c0_i32 = arith.constant 0 : i32
    %c0_i32_0 = arith.constant 0 : i32
    return %arg0, %c0_i32, %arg1 : i32, i32, i32
  }
  func.func @transform_4(%arg0: i32, %arg1: i32) -> (i32, i32, i32) {
    %c0_i32 = arith.constant 0 : i32
    %c0_i32_0 = arith.constant 0 : i32
    return %arg0, %c0_i32, %arg1 : i32, i32, i32
  }
  func.func @transform_5(%arg0: i32, %arg1: i32) -> (i32, i32, i32) {
    %c0_i32 = arith.constant 0 : i32
    %c0_i32_0 = arith.constant 0 : i32
    return %arg0, %c0_i32, %arg1 : i32, i32, i32
  }
}

</mosaic_0001>

<bundles_post_ra>
// kernel: conv_lstm_cell_prepared.1
= control target key start
LH: loop header
LB: loop body
LE: loop exit
PB: predicated region body
PF: predicated region fallthrough
CT: control target
= control target key end

     0   :  { %s1890_s18 = smov 0   ;;  %s1892_s19 = smov 0   ;;  %s2106_s0 = inlined_call_operand.vmem [shape: bf16[2,16,384], index: 0, kind: input, shape index: {}]   ;;  %s2107_s1 = inlined_call_operand.vmem [shape: bf16[9,32,16], index: 1, kind: input, shape index: {}]   ;;  %s2108_s2 = inlined_call_operand.vmem [shape: f32[32,1], index: 2, kind: input, shape index: {}]   ;;  %s2109_s3 = inlined_call_operand.vmem [shape: f32[2,8,256], index: 3, kind: input, shape index: {}]   ;;  %s2110_s4 = inlined_call_operand.vmem [shape: f32[2,8,256], index: 4, kind: output, shape index: {0}]   ;;  %s2111_s5 = inlined_call_operand.vmem [shape: f32[2,8,256], index: 5, kind: output, shape index: {1}]  }
   0x1   :  { %s1894_s20 = smov 0  }
   0x2 LB: > { %s28_s21 = sadd.s32 1, %s1839_s19  ;;  %p1563_p0 = scmp.ge.s32.totalorder %s1843_s20, 1  ;;  %s1843_s20 = sphi %s1894_s20, %s16_s20   ;;  %s1839_s19 = sphi %s1892_s19, %s2113_s19   ;;  %s1835_s18 = sphi %s1890_s18, %s2112_s18  }
   0x3   : > { %p30_p1 = scmp.ge.s32.totalorder %s28_s21, 2  ;;  %p223_p2 = scmp.lt.s32.totalorder %s1843_s20, 3 }
   0x5   : > { %s2115_s21 = smov (%p30_p1, %s28_s21), 0  ;;  %p224_p3 = pnand %p1563_p0, %p223_p2 }
   0x6   : > { %v309_v0 = vlaneseq (!%p224_p3)  ;;  %p273_p4 = scmp.lt.s32.totalorder (!%p224_p3), %s1835_s18, 1  ;;  %v1845_v9 = vmov (!%p224_p3), 0.0   ;;  %s1846_s26 = smov (!%p224_p3), 18   ;;  %v1853_v23 = vmov (!%p224_p3), 0   ;;  %vm895_vm4 = vcmask (!%p224_p3), 146432  }
   0x7   : > { %227 = sbr.rel (%p224_p3) target bundleno = 569 (0x239), region = 36  ;;  %s1847_s27 = smov (!%p224_p3), 2   ;;  %446 = vmatprep.mubr.bf16.mxu1 (!%p224_p3), %v1853_v23  ;;  %863 = vmatprep.mubr.bf16.mxu0 (!%p224_p3), %v1853_v23  ;;  %vm1012_vm5 = vcmask (!%p224_p3), 261120   ;;  %vm568_vm6 = vcmask (!%p224_p3), 15360   ;;  %vm402_vm7 = vcmask (!%p224_p3), 1039360   ;;  %vm820_vm8 = vcmask (!%p224_p3), 908288  }
   0x8   : > { %v310_v1 = vand.u32 (!%p224_p3), 127, %v309_v0  ;;  %s1848_s28 = smov (!%p224_p3), 32   ;;  %s1849_s29 = smov (!%p224_p3), 16   ;;  %1778 = vset.pattern.permute.xlu1 (!%p224_p3), %v1853_v23  ;;  %1779 = vset.pattern.permute.xlu0 (!%p224_p3), %v1853_v23  ;;  %vm407_vm9 = vcmask (!%p224_p3), 130048   ;;  %vm1222_vm10 = vcmask (!%p224_p3), 277504   ;;  %vm937_vm11 = vcmask (!%p224_p3), 900096  }
   0x9   : > { %s1850_s30 = smov (!%p224_p3), 127   ;;  %s1851_s6 = smov (!%p224_p3), 34   ;;  %vm1054_vm12 = vcmask (!%p224_p3), 785408   ;;  %vm610_vm13 = vcmask (!%p224_p3), 1031168   ;;  %vm1147_vm14 = vcmask (!%p224_p3), 777216   ;;  %vm727_vm15 = vcmask (!%p224_p3), 916480  }
   0xa   : > { %v311_v2 = vadd.s32 (!%p224_p3), 128, %v310_v1  ;;  %v316_v3 = vand.u32 (!%p224_p3), 15, %v310_v1  ;;  %s1852_s7 = smov (!%p224_p3), 111   ;;  %s1854_s8 = smov (!%p224_p3), 110  }
   0xb   : > { %s1855_s9 = smov (!%p224_p3), 96   ;;  %s1856_s12 = smov (!%p224_p3), 126  }
   0xc   : > { %v323_v4 = vand.u32 (!%p224_p3), 15, %v311_v2  ;;  %v546_v5 = vadd.s32 (!%p224_p3), 1, %v316_v3  ;;  %v338_v6 = vadd.s32 (!%p224_p3), 4294967295, %v316_v3  ;;  %v1783_v2 = vld [vmem:[%s2107_s1 + $0x10] sm:$0xff] (!%p224_p3)   ;;  %s1857_s15 = smov (!%p224_p3), 95  }
   0xe   : > { %s2117_s18 = smov (!%p273_p4, %s1835_s18), 1  ;;  %v547_v7 = vadd.s32 1, %v323_v4  ;;  %vm550_vm0 = vcmp.lt.s32.totalorder %v546_v5, 16  ;;  %v339_v8 = vadd.s32 4294967295, %v323_v4  ;;  %vm340_vm1 = vcmp.ge.s32.totalorder %v338_v6, 0 }
   0xf   : > { %s1738_s22 = smul.u32 24, %s2117_s18  ;;  %v1591_v10 = vsel %vm550_vm0, 1.0, %v1845_v9  ;;  %v1571_v11 = vsel %vm340_vm1, 1.0, %v1845_v9  ;;  %vm1264_vm0 = vcmask 769024   ;;  %s2083_s16 = sshll.u32 %s2117_s18, 4 }
  0x10   : > { %vm551_vm2 = vcmp.lt.s32.totalorder %v547_v7, 16  ;;  %vm341_vm3 = vcmp.ge.s32.totalorder %v339_v8, 0  ;;  %s286_s23 = scalar_lea.vmem %s2109_s3, %s2083_s16 }
  0x11   : > { %s277_s25 = scalar_lea.vmem %s2106_s0, %s1738_s22  ;;  %v1592_v12 = vsel %vm551_vm2, 1.0, %v1845_v9  ;;  %v1572_v13 = vsel %vm341_vm3, 1.0, %v1845_v9  ;;  %s1858_s22 = smov 112  }
  0x12   : > { %v1671_v14 = vpack.c.bf16 %v1592_v12, %v1591_v10  ;;  %v1914_v15 = vld [vmem:[%s277_s25 + $0x8] sm:$0xf]  ;;  %v1916_v16 = vld [vmem:[%s277_s25 + $0x14] sm:$0xf]  ;;  %v1918_v17 = vld [vmem:[%s277_s25] sm:$0xff]  ;;  %v1670_v19 = vpack.c.bf16 %v1572_v13, %v1571_v11 }
  0x13   : > { %v1920_v18 = vld [vmem:[%s277_s25 + $0xc] sm:$0xff]  ;;  %v1924_v20 = vcombine.low %v1914_v15, %v1916_v16  ;;  %v1785_v10 = vld [vmem:[%s2107_s1 + $0x40] sm:$0xff]   ;;  %s1859_s25 = smov 94  }
  0x14   : > { %892 = vrot.lane.b32.xlu0 %v1671_v14, %s1846_s26  ;;  %565 = vrot.lane.b32.xlu1 %v1671_v14, %s1847_s27  ;;  %v1928_v21 = vcombine.high %v1918_v17, %v1920_v18  ;;  %v1935_v22 = vcombine.low %v1918_v17, %v1920_v18  ;;  %v358_v49 = vmul.bf16 %v1670_v19, %v1918_v17 }
  0x15   : > { %v359_v53 = vmul.bf16 %v1670_v19, %v1920_v18 }
  0x17   : > { %v1588_v59 = vcombine.high %v358_v49, %v359_v53  ;;  %v1587_v4 = vcombine.low %v358_v49, %v359_v53 }
  0x18   : > { %1009 = vrot.lane.b32.xlu0 %v1670_v19, %s1848_s28  ;;  %682 = vrot.lane.b32.xlu1 %v1670_v19, %s1849_s29  ;;  %s296_s28 = scalar_lea.vmem %s2110_s4, %s2083_s16 }
  0x1c   : > { %400 = vrot.lane.b32.xlu0 %v1924_v20, %s1850_s30  ;;  %398 = vrot.lane.b32.xlu1 %v1928_v21, %s1850_s30 }
  0x20   : > { %1219 = vrot.lane.b32.xlu0 %v1671_v14, %s1851_s6  ;;  %816 = vrot.lane.b32.xlu1 %v1928_v21, %s1852_s7 }
  0x24   : > { %396 = vrot.lane.b32.xlu1 %v1935_v22, %s1850_s30  ;;  %818 = vrot.lane.b32.xlu0 %v1924_v20, %s1852_s7 }
  0x28   : > { %814 = vrot.lane.b32.xlu0 %v1935_v22, %s1852_s7 }
  0x86   : > { %v893_v24 = vpop.permute.xlu0 %892  ;;  %v566_v25 = vpop.permute.xlu1 %565 }
  0x87   : > { %v894_v26 = vrot.slane %v893_v24, 4  ;;  %v567_v30 = vrot.slane %v566_v25, 4 }
  0x89   : > { %v896_v27 = vsel %vm895_vm4, %v894_v26, %v893_v24  ;;  %v900_v28 = vmul.bf16 %v894_v26, %v1914_v15  ;;  %v902_v29 = vmul.bf16 %v894_v26, %v1916_v16  ;;  %v569_v39 = vsel %vm568_vm6, %v567_v30, %v566_v25  ;;  %v1784_v24 = vld [vmem:[%s2107_s1 + $0x18] sm:$0xff]  }
  0x8a   : > { %v899_v31 = vmul.bf16 %v896_v27, %v1918_v17  ;;  %v901_v32 = vmul.bf16 %v896_v27, %v1920_v18  ;;  %v1010_v33 = vpop.permute.xlu0 %1009  ;;  %v683_v34 = vpop.permute.xlu1 %682  ;;  %v572_v50 = vmul.bf16 %v569_v39, %v1918_v17  ;;  %v574_v51 = vmul.bf16 %v569_v39, %v1920_v18 }
  0x8b   : > { %v1011_v35 = vrot.slane %v1010_v33, 4  ;;  %v1632_v36 = vcombine.low %v900_v28, %v902_v29  ;;  %v573_v52 = vmul.bf16 %v567_v30, %v1914_v15  ;;  %v575_v56 = vmul.bf16 %v567_v30, %v1916_v16 }
  0x8c   : > { %v1631_v37 = vcombine.high %v899_v31, %v901_v32  ;;  %v1630_v46 = vcombine.low %v899_v31, %v901_v32  ;;  %v1601_v60 = vcombine.high %v572_v50, %v574_v51  ;;  %v684_v62 = vrot.slane %v683_v34, 4  ;;  %v1337_v31 = vld [vmem:[%s2108_s2 + $0x8] sm:$0xff]  ;;  %v1339_v32 = vld [vmem:[%s2108_s2 + $0x18] sm:$0xff] }
  0x8d   : > { %v1013_v38 = vsel %vm1012_vm5, %v1011_v35, %v1010_v33  ;;  %935 = vrot.lane.b32.xlu0 %v1632_v36, %s1854_s8  ;;  %v1017_v42 = vmul.bf16 %v1011_v35, %v1914_v15  ;;  %v1019_v43 = vmul.bf16 %v1011_v35, %v1916_v16  ;;  %v1602_v61 = vcombine.low %v573_v52, %v575_v56  ;;  %v1338_v33 = vld [vmem:[%s2108_s2 + $0x10] sm:$0xff]  ;;  %v1790_v52 = vld [vmem:[%s2107_s1 + $0x20] sm:$0xff]  }
  0x8e   : > { %v1016_v40 = vmul.bf16 %v1013_v38, %v1918_v17  ;;  %v1018_v41 = vmul.bf16 %v1013_v38, %v1920_v18  ;;  %933 = vrot.lane.b32.xlu1 %v1631_v37, %s1854_s8  ;;  %v401_v44 = vpop.permute.xlu0 %400  ;;  %v399_v45 = vpop.permute.xlu1 %398  ;;  %v686_v5 = vsel %vm407_vm9, %v684_v62, %v683_v34  ;;  %v1600_v6 = vcombine.low %v572_v50, %v574_v51 }
  0x8f   : > { %v404_v48 = vsel %vm402_vm7, %v399_v45, %v401_v44  ;;  %v1643_v54 = vcombine.low %v1017_v42, %v1019_v43  ;;  %v689_v11 = vmul.bf16 %v686_v5, %v1918_v17  ;;  %v691_v12 = vmul.bf16 %v686_v5, %v1920_v18 }
  0x90   : > { %v1642_v47 = vcombine.high %v1016_v40, %v1018_v41  ;;  %414 = vmatprep.subr.bf16.mxu1 %v404_v48  ;;  %v1641_v55 = vcombine.low %v1016_v40, %v1018_v41  ;;  %v690_v13 = vmul.bf16 %v684_v62, %v1914_v15  ;;  %v692_v14 = vmul.bf16 %v684_v62, %v1916_v16  ;;  %v1787_v40 = vld [vmem:[%s2107_s1 + $0x50] sm:$0xff]   ;;  %v1789_v48 = vld [vmem:[%s2107_s1 + $0x58] sm:$0xff]  }
  0x91   : > { %v1612_v25 = vcombine.high %v689_v11, %v691_v12  ;;  %v1611_v28 = vcombine.low %v689_v11, %v691_v12  ;;  %v1799_v11 = vld [vmem:[%s2107_s1 + $0x80] sm:$0xff]   ;;  %v1800_v12 = vld [vmem:[%s2107_s1 + $0x88] sm:$0xff]  }
  0x92   : > { %931 = vrot.lane.b32.xlu1 %v1630_v46, %s1854_s8  ;;  %1050 = vrot.lane.b32.xlu0 %v1642_v47, %s1855_s9  ;;  %v1220_v57 = vpop.permute.xlu0 %1219  ;;  %v817_v58 = vpop.permute.xlu1 %816  ;;  %v1613_v26 = vcombine.low %v690_v13, %v692_v14 }
  0x93   : > { %v1221_v8 = vrot.slane %v1220_v57, 4 }
  0x95   : > { %v1223_v19 = vsel %vm1222_vm10, %v1221_v8, %v1220_v57  ;;  %v1227_v30 = vmul.bf16 %v1221_v8, %v1914_v15  ;;  %v1788_v15 = vld [vmem:[%s2107_s1 + $0x8] sm:$0xff]  }
  0x96   : > { %1052 = vrot.lane.b32.xlu1 %v1643_v54, %s1855_s9  ;;  %1048 = vrot.lane.b32.xlu0 %v1641_v55, %s1855_s9  ;;  %v397_v63 = vpop.permute.xlu1 %396  ;;  %v819_v0 = vpop.permute.xlu0 %818  ;;  %v1228_v27 = vmul.bf16 %v1223_v19, %v1920_v18  ;;  %v1791_v55 = vld [vmem:[%s2107_s1 + $0x60] sm:$0xff]  }
  0x97   : > { %v403_v1 = vsel %vm402_vm7, %v397_v63, %v399_v45  ;;  %v1964_v3 = vsel %vm820_vm8, %v817_v58, %v819_v0  ;;  %v1793_v0 = vld [vmem:[%s2107_s1 + $0x68] sm:$0xff]  }
  0x98   : > { %415 = vmatpush1.bf16.msra.mxu1 %v403_v1  ;;  %831 = vmatprep.subr.bf16.mxu0 %v1964_v3 }
  0x99   : > { %493 = vmatprep.subr.bf16.mxu1 %v1588_v59 }
  0x9a   : > { %606 = vrot.lane.b32.xlu1 %v1601_v60, %s1856_s12  ;;  %608 = vrot.lane.b32.xlu0 %v1602_v61, %s1856_s12  ;;  %v815_v7 = vpop.permute.xlu0 %814  ;;  %v1792_v60 = vld [vmem:[%s2107_s1 + $0x28] sm:$0xff]  }
  0x9b   : > { %1583 = vmatmul.mubr.msk.bf16.vlgmr.msra.gmra.mrb[0].mxu1 %vm407_vm9, %v1783_v2  ;;  %v1970_v9 = vsel %vm820_vm8, %v815_v7, %v817_v58  ;;  %v1795_v7 = vld [vmem:[%s2107_s1 + $0x70] sm:$0xff]  }
  0x9c   : > { %832 = vmatpush1.bf16.msra.mxu0 %v1970_v9  ;;  %456 = vmatprep.mubr.bf16.mxu1 %v1853_v23 }
  0x9d   : > { %494 = vmatpush1.bf16.msra.mxu1 %v1587_v4  ;;  %v1794_v4 = vld [vmem:[%s2107_s1 + $0x30] sm:$0xff]  }
  0x9e   : > { %604 = vrot.lane.b32.xlu1 %v1600_v6, %s1856_s12  ;;  %1143 = vrot.lane.b32.xlu0 %v1928_v21, %s1857_s15  ;;  %v1226_v21 = vmul.bf16 %v1223_v19, %v1918_v17 }
  0x9f   : > { %1622 = vmatmul.mubr.msk.bf16.vlgmr.msra.gmra.mrb[0].mxu0 %vm407_vm9, %v1785_v10  ;;  %v1797_v10 = vld [vmem:[%s2107_s1 + $0x78] sm:$0xff]  }
  0xa0   : > { %980 = vmatprep.mubr.bf16.mxu0 %v1853_v23  ;;  %v1661_v29 = vcombine.high %v1226_v21, %v1228_v27  ;;  %v1660_v18 = vcombine.low %v1226_v21, %v1228_v27 }
  0xa2   : > { %1145 = vrot.lane.b32.xlu1 %v1924_v20, %s1857_s15  ;;  %1141 = vrot.lane.b32.xlu0 %v1935_v22, %s1857_s15  ;;  %v1229_v20 = vmul.bf16 %v1221_v8, %v1916_v16  ;;  %v1786_v22 = vld [vmem:[%s2107_s1] sm:$0xff]   ;;  %v1796_v8 = vld [vmem:[%s2107_s1 + $0x38] sm:$0xff]  }
  0xa3   : > { %1584 = vmatmul.mubr.msk.bf16.gmra.mrb[4].mxu1 %vm407_vm9, %v1784_v24  ;;  %v1336_v16 = vld [vmem:[%s2108_s2] sm:$0xff] }
  0xa4   : > { %525 = vmatprep.mubr.bf16.mxu1 %v1853_v23  ;;  %v1662_v17 = vcombine.low %v1227_v30, %v1229_v20 }
  0xa6   : > { %723 = vrot.lane.b32.xlu1 %v1612_v25, %s1858_s22  ;;  %725 = vrot.lane.b32.xlu0 %v1613_v26, %s1858_s22 }
  0xaa   : > { %721 = vrot.lane.b32.xlu1 %v1611_v28, %s1858_s22  ;;  %1260 = vrot.lane.b32.xlu0 %v1661_v29, %s1859_s25 }
  0xab   : > { %1589 = vmatmul.mubr.msk.bf16.vlgmr.msra.gmra.mrb[0].mxu1 %vm407_vm9, %v1786_v22 }
  0xac   : > { %535 = vmatprep.mubr.bf16.mxu1 %v1853_v23 }
  0xae   : > { %1262 = vrot.lane.b32.xlu1 %v1662_v17, %s1859_s25  ;;  %1258 = vrot.lane.b32.xlu0 %v1660_v18, %s1859_s25  ;;  %s306_s25 = scalar_lea.vmem %s2111_s5, %s2083_s16 }
  0xb2   : > { %1342 = vperm.xlu1 %1778, %v1336_v16   ;;  %1347 = vperm.xlu0 %1779, %v1337_v31  }
  0xb3   : > { %1590 = vmatmul.mubr.msk.bf16.gmra.mrb[4].mxu1 %vm407_vm9, %v1788_v15 }
  0xb4   : > { %653 = vmatprep.mubr.bf16.mxu1 %v1853_v23 }
  0xb6   : > { %1357 = vperm.xlu1 %1778, %v1339_v32  }
  0xba   : > { %1352 = vperm.xlu1 %1778, %v1338_v33  }
  0xff   : > { %v936_v34 = vpop.permute.xlu0 %935 }
 0x100   : > { %v934_v35 = vpop.permute.xlu1 %933 }
 0x101   : > { %v939_v36 = vsel %vm937_vm11, %v934_v35, %v936_v34 }
 0x102   : > { %948 = vmatprep.subr.bf16.mxu0 %v939_v36 }
 0x104   : > { %v932_v37 = vpop.permute.xlu1 %931  ;;  %v1051_v38 = vpop.permute.xlu0 %1050 }
 0x105   : > { %v938_v39 = vsel %vm937_vm11, %v932_v37, %v934_v35 }
 0x106   : > { %949 = vmatpush1.bf16.msra.mxu0 %v938_v39 }
 0x108   : > { %v1053_v41 = vpop.permute.xlu1 %1052  ;;  %v1049_v42 = vpop.permute.xlu0 %1048 }
 0x109   : > { %v1055_v43 = vsel %vm1054_vm12, %v1049_v42, %v1051_v38  ;;  %1633 = vmatmul.mubr.msk.bf16.vlgmr.msra.gmra.mrb[0].mxu0 %vm407_vm9, %v1787_v40  ;;  %v1056_v44 = vsel %vm1054_vm12, %v1051_v38, %v1053_v41 }
 0x10a   : > { %1065 = vmatprep.subr.bf16.mxu0 %v1056_v44  ;;  %990 = vmatprep.mubr.bf16.mxu0 %v1853_v23 }
 0x10b   : > { %1066 = vmatpush1.bf16.msra.mxu0 %v1055_v43 }
 0x10c   : > { %v607_v45 = vpop.permute.xlu1 %606  ;;  %v609_v46 = vpop.permute.xlu0 %608 }
 0x10d   : > { %v612_v47 = vsel %vm610_vm13, %v607_v45, %v609_v46 }
 0x10e   : > { %621 = vmatprep.subr.bf16.mxu1 %v612_v47 }
 0x110   : > { %v605_v49 = vpop.permute.xlu1 %604  ;;  %v1144_v50 = vpop.permute.xlu0 %1143 }
 0x111   : > { %v611_v51 = vsel %vm610_vm13, %v605_v49, %v607_v45  ;;  %1634 = vmatmul.mubr.msk.bf16.gmra.mrb[4].mxu0 %vm407_vm9, %v1789_v48 }
 0x112   : > { %622 = vmatpush1.bf16.msra.mxu1 %v611_v51  ;;  %1097 = vmatprep.mubr.bf16.mxu0 %v1853_v23 }
 0x114   : > { %v1146_v53 = vpop.permute.xlu1 %1145  ;;  %v1142_v54 = vpop.permute.xlu0 %1141 }
 0x115   : > { %1603 = vmatmul.mubr.msk.bf16.vlgmr.msra.gmra.mrb[0].mxu1 %vm407_vm9, %v1790_v52  ;;  %v1149_v56 = vsel %vm1147_vm14, %v1144_v50, %v1146_v53  ;;  %v1148_v57 = vsel %vm1147_vm14, %v1142_v54, %v1144_v50 }
 0x116   : > { %1158 = vmatprep.subr.bf16.mxu0 %v1149_v56  ;;  %663 = vmatprep.mubr.bf16.mxu1 %v1853_v23 }
 0x118   : > { %v724_v58 = vpop.permute.xlu1 %723  ;;  %v726_v59 = vpop.permute.xlu0 %725 }
 0x119   : > { %1644 = vmatmul.mubr.msk.bf16.vlgmr.msra.gmra.mrb[0].mxu0 %vm407_vm9, %v1791_v55  ;;  %v729_v61 = vsel %vm727_vm15, %v724_v58, %v726_v59 }
 0x11a   : > { %738 = vmatprep.subr.bf16.mxu1 %v729_v61  ;;  %1159 = vmatpush1.bf16.msra.mxu0 %v1148_v57 }
 0x11b   : > { %1107 = vmatprep.mubr.bf16.mxu0 %v1853_v23 }
 0x11c   : > { %v722_v62 = vpop.permute.xlu1 %721  ;;  %v1261_v1 = vpop.permute.xlu0 %1260 }
 0x11d   : > { %v728_v63 = vsel %vm727_vm15, %v722_v62, %v724_v58  ;;  %1604 = vmatmul.mubr.msk.bf16.gmra.mrb[4].mxu1 %vm407_vm9, %v1792_v60 }
 0x11e   : > { %739 = vmatpush1.bf16.msra.mxu1 %v728_v63  ;;  %770 = vmatprep.mubr.bf16.mxu1 %v1853_v23 }
 0x11f   : > { %1672 = vmatprep.subr.bf16.mxu1 %v1964_v3 }
 0x120   : > { %v1263_v2 = vpop.permute.xlu1 %1262  ;;  %v1259_v6 = vpop.permute.xlu0 %1258 }
 0x121   : > { %1645 = vmatmul.mubr.msk.bf16.gmra.mrb[4].mxu0 %vm407_vm9, %v1793_v0  ;;  %v1266_v5 = vsel %vm1264_vm0, %v1261_v1, %v1263_v2  ;;  %v1265_v3 = vsel %vm1264_vm0, %v1259_v6, %v1261_v1  ;;  %v1394_v0 = vld [vmem:[%s286_s23] sm:$0xff] }
 0x122   : > { %1190 = vmatprep.mubr.bf16.mxu0 %v1853_v23  ;;  %1275 = vmatprep.subr.bf16.mxu0 %v1266_v5  ;;  %v1395_v5 = vld [vmem:[%s286_s23 + $0x8] sm:$0xff] }
 0x125   : > { %1614 = vmatmul.mubr.msk.bf16.vlgmr.msra.gmra.mrb[0].mxu1 %vm407_vm9, %v1794_v4 }
 0x126   : > { %1673 = vmatpush1.bf16.msra.mxu1 %v1970_v9  ;;  %780 = vmatprep.mubr.bf16.mxu1 %v1853_v23  ;;  %v1798_v9 = vld [vmem:[%s2107_s1 + $0x48] sm:$0xff]  }
 0x129   : > { %1652 = vmatmul.mubr.msk.bf16.vlgmr.msra.gmra.mrb[0].mxu0 %vm407_vm9, %v1795_v7 }
 0x12a   : > { %1276 = vmatpush1.bf16.msra.mxu0 %v1265_v3  ;;  %1200 = vmatprep.mubr.bf16.mxu0 %v1853_v23 }
 0x12d   : > { %1615 = vmatmul.mubr.msk.bf16.gmra.mrb[4].mxu1 %vm407_vm9, %v1796_v8 }
 0x12e   : > { %873 = vmatprep.mubr.bf16.mxu1 %v1853_v23 }
 0x131   : > { %1653 = vmatmul.mubr.msk.bf16.gmra.mrb[4].mxu0 %vm407_vm9, %v1797_v10  ;;  %v1343_v25 = vpop.permute.xlu1 %1342  ;;  %v1348_v26 = vpop.permute.xlu0 %1347 }
 0x132   : > { %1307 = vmatprep.mubr.bf16.mxu0 %v1853_v23 }
 0x135   : > { %v1358_v38 = vpop.permute.xlu1 %1357 }
 0x139   : > { %1623 = vmatmul.mubr.msk.bf16.vlgmr.msra.gmra.mrb[4].mxu1 %vm407_vm9, %v1798_v9  ;;  %1663 = vmatmul.mubr.msk.bf16.vlgmr.msra.gmra.mrb[0].mxu0 %vm407_vm9, %v1799_v11  ;;  %v1353_v49 = vpop.permute.xlu1 %1352 }
 0x13a   : > { %1317 = vmatprep.mubr.bf16.mxu0 %v1853_v23 }
 0x141   : > { %1664 = vmatmul.mubr.msk.bf16.gmra.mrb[4].mxu0 %vm407_vm9, %v1800_v12 }
 0x1f8   : > { %v772_v13 = vpop.f32.mrb[0].mxu1 }
 0x1f9   : > { %v774_v14 = vpop.f32.mrb[1].mxu1 }
 0x1fa   : > { %v776_v19 = vpop.f32.mrb[2].mxu1 }
 0x1fb   : > { %v778_v24 = vpop.f32.mrb[3].mxu1 }
 0x20c   : > { %v875_v21 = vpop.f32.mrb[4].mxu1  ;;  %v1309_v27 = vpop.f32.mrb[0].mxu0 }
 0x20d   : > { %v1674_v28 = vadd.f32 %v1309_v27, %v772_v13  ;;  %v877_v29 = vpop.f32.mrb[5].mxu1  ;;  %v1311_v30 = vpop.f32.mrb[1].mxu0 }
 0x20e   : > { %v1675_v20 = vadd.f32 %v1311_v30, %v774_v14  ;;  %v1313_v22 = vpop.f32.mrb[2].mxu0  ;;  %v879_v23 = vpop.f32.mrb[6].mxu1 }
 0x20f   : > { %v1676_v17 = vadd.f32 %v1313_v22, %v776_v19  ;;  %v1360_v18 = vadd.f32 %v1674_v28, %v1343_v25  ;;  %v881_v15 = vpop.f32.mrb[7].mxu1  ;;  %v1315_v16 = vpop.f32.mrb[3].mxu0 }
 0x210   : > { %v1361_v31 = vadd.f32 %v1675_v20, %v1343_v25  ;;  %v1677_v32 = vadd.f32 %v1315_v16, %v778_v24 }
 0x211   : > { %v1368_v33 = vmul.f32 0.5, %v1360_v18  ;;  %v1362_v34 = vadd.f32 %v1676_v17, %v1348_v26 }
 0x212   : > { %v1369_v35 = vmul.f32 0.5, %v1361_v31  ;;  %v1363_v36 = vadd.f32 %v1677_v32, %v1348_v26 }
 0x213   : > { %1801 = vtanh.f32 %v1368_v33  ;;  %v1376_v37 = vmul.f32 0.5, %v1362_v34 }
 0x214   : > { %1803 = vtanh.f32 %v1369_v35  ;;  %v1377_v39 = vmul.f32 0.5, %v1363_v36  ;;  %v1319_v40 = vpop.f32.mrb[4].mxu0 }
 0x215   : > { %1805 = vtanh.f32 %v1376_v37  ;;  %v1678_v41 = vadd.f32 %v1319_v40, %v875_v21  ;;  %v1321_v42 = vpop.f32.mrb[5].mxu0 }
 0x216   : > { %1807 = vtanh.f32 %v1377_v39  ;;  %v1679_v43 = vadd.f32 %v1321_v42, %v877_v29  ;;  %v1323_v44 = vpop.f32.mrb[6].mxu0 }
 0x217   : > { %v1680_v45 = vadd.f32 %v1323_v44, %v879_v23  ;;  %v1325_v46 = vpop.f32.mrb[7].mxu0  ;;  %v1364_v50 = vadd.f32 %v1678_v41, %v1353_v49 }
 0x218   : > { %v1681_v47 = vadd.f32 %v1325_v46, %v881_v15  ;;  %v1365_v53 = vadd.f32 %v1679_v43, %v1353_v49 }
 0x219   : > { %v1366_v48 = vadd.f32 %v1680_v45, %v1358_v38  ;;  %v1384_v55 = vmul.f32 0.5, %v1364_v50 }
 0x21a   : > { %v1367_v51 = vadd.f32 %v1681_v47, %v1358_v38  ;;  %v1385_v61 = vmul.f32 0.5, %v1365_v53 }
 0x21b   : > { %1809 = vtanh.f32 %v1366_v48 }
 0x21c   : > { %1811 = vtanh.f32 %v1367_v51 }
 0x21d   : > { %v1802_v52 = vpop.eup %1801  ;;  %1813 = vtanh.f32 %v1384_v55 }
 0x21e   : > { %v1804_v54 = vpop.eup %1803  ;;  %v1372_v58 = vmul.f32 0.5, %v1802_v52  ;;  %1815 = vtanh.f32 %v1385_v61 }
 0x21f   : > { %v1806_v56 = vpop.eup %1805  ;;  %v1373_v63 = vmul.f32 0.5, %v1804_v54 }
 0x220   : > { %v1808_v57 = vpop.eup %1807  ;;  %v1380_v59 = vmul.f32 0.5, %v1806_v56  ;;  %v1374_v1 = vadd.f32 0.5, %v1372_v58 }
 0x221   : > { %v1381_v60 = vmul.f32 0.5, %v1808_v57  ;;  %v1375_v3 = vadd.f32 0.5, %v1373_v63 }
 0x222   : > { %v1382_v62 = vadd.f32 0.5, %v1380_v59 }
 0x223   : > { %v1383_v4 = vadd.f32 0.5, %v1381_v60 }
 0x224   : > { %v1396_v6 = vmul.f32 %v1394_v0, %v1382_v62 }
 0x225   : > { %v1810_v2 = vpop.eup %1809  ;;  %v1397_v9 = vmul.f32 %v1395_v5, %v1383_v4 }
 0x226   : > { %v1398_v7 = vmul.f32 %v1810_v2, %v1374_v1  ;;  %v1812_v8 = vpop.eup %1811 }
 0x227   : > { %v1399_v11 = vmul.f32 %v1812_v8, %v1375_v3  ;;  %v1814_v13 = vpop.eup %1813 }
 0x228   : > { %v1400_v10 = vadd.f32 %v1398_v7, %v1396_v6  ;;  %v1816_v14 = vpop.eup %1815  ;;  %v1388_v19 = vmul.f32 0.5, %v1814_v13 }
 0x229   : > { %v1401_v12 = vadd.f32 %v1399_v11, %v1397_v9  ;;  %v1389_v24 = vmul.f32 0.5, %v1816_v14 }
 0x22a   : > { %1406 = vst [vmem:[%s306_s25] sm:$0xff] %v1400_v10  ;;  %1817 = vtanh.f32 %v1400_v10  ;;  %v1390_v25 = vadd.f32 0.5, %v1388_v19 }
 0x22b   : > { %1819 = vtanh.f32 %v1401_v12  ;;  %1407 = vst [vmem:[%s306_s25 + $0x8] sm:$0xff] %v1401_v12  ;;  %v1391_v27 = vadd.f32 0.5, %v1389_v24 }
 0x234   : > { %v1818_v26 = vpop.eup %1817 }
 0x235   : > { %v1404_v21 = vmul.f32 %v1818_v26, %v1390_v25  ;;  %v1820_v28 = vpop.eup %1819 }
 0x236   : > { %v1405_v29 = vmul.f32 %v1820_v28, %v1391_v27 }
 0x237   : > { %1408 = vst [vmem:[%s296_s28] sm:$0xff] %v1404_v21 }
 0x238   : > { %1409 = vst [vmem:[%s296_s28 + $0x8] sm:$0xff] %v1405_v29 }
 0x239 PF: > { %s16_s20 = sadd.s32 1, %s1843_s20   ;;  %s2112_s18 = smov %s1839_s19 }
 0x23a   : > { %p13_p5 = scmp.ge.s32.totalorder %s16_s20, 4   ;;  %s2113_s19 = smov %s2115_s21 }
 0x23c   :  { %15 = sbr.rel (!%p13_p5) target bundleno = 2 (0x2), region = 89 }

</bundles_post_ra>
